<compile_context>
chip_gen: v6e
topology: v6e:2x2x1
jax: 0.10.0
libtpu: 0.0.40
codegen_flags: <defaults>
</compile_context>

<pallas_src>
import functools

import jax
import jax.numpy as jnp
from jax.experimental import pallas as pl
from jax.experimental.pallas import tpu as pltpu

EPS = 1e-5


# -----------------------------------------------------------------------------
# Init-time parameter fusion (hoisted out of the per-call hot path).
# -----------------------------------------------------------------------------
def fuse_params(w, b, gamma, beta):
    """Pre-fuse parameters once.

    w: (4, Din, Dout), b: (4, Dout), gamma/beta: (Dout,)
    Returns:
      wc: (Din, 4*Dout)  lane-dense concatenated Linear weights
      pp: (8, 4*Dout)    packed small params:
            row 0 = concatenated biases
            row 1 = [gamma | beta | zero-pad]
    """
    four, din, dout = w.shape
    assert four == 4
    wc = jnp.concatenate([w[0], w[1], w[2], w[3]], axis=-1)          # (Din, 4*Dout)
    bc = b.reshape(1, 4 * dout)                                      # row-major == concat order
    row1 = jnp.concatenate(
        [gamma.reshape(1, dout), beta.reshape(1, dout),
         jnp.zeros((1, 2 * dout), dtype=wc.dtype)], axis=-1)
    pp = jnp.concatenate([bc, row1, jnp.zeros((6, 4 * dout), dtype=wc.dtype)],
                         axis=0)                                     # (8, 4*Dout)
    return jax.block_until_ready(wc), jax.block_until_ready(pp)


# -----------------------------------------------------------------------------
# Small-batch kernel: everything in one VMEM-resident invocation.
# -----------------------------------------------------------------------------
def _nlfi_single_kernel(x_ref, wc_ref, pp_ref, o_ref):
    dout = o_ref.shape[-1]
    x = x_ref[...]                                                   # (B, Din) f32

    # One fused lane-dense MXU matmul for all four linear layers.
    bc = pp_ref[0:1, :]                                              # (1, 4*Dout)
    y = jnp.dot(x, wc_ref[...], preferred_element_type=jnp.float32) + bc

    nl1 = y[:, 0 * dout:1 * dout]
    nl2 = y[:, 1 * dout:2 * dout]
    nl3 = y[:, 2 * dout:3 * dout]
    nl4 = y[:, 3 * dout:4 * dout]

    # Branch 1: elementwise product + BatchNorm1d (training-mode batch stats).
    prod = nl1 * nl2
    inv_b = 1.0 / prod.shape[0]
    mean = jnp.sum(prod, axis=0, keepdims=True) * inv_b
    mean_sq = jnp.sum(prod * prod, axis=0, keepdims=True) * inv_b
    var = jnp.maximum(mean_sq - mean * mean, 0.0)                    # clamp single-pass var
    inv_std = jax.lax.rsqrt(var + EPS)
    gamma = pp_ref[1:2, 0:dout]
    beta = pp_ref[1:2, dout:2 * dout]
    scale = inv_std * gamma
    shift = beta - mean * scale
    nlfs1 = prod * scale + shift                                     # one FMA per element

    # Branch 2: sigmoid * tanh (EUP).
    nlfs2 = jax.nn.sigmoid(nl3) * jnp.tanh(nl4)

    o_ref[...] = (nlfs1 + nlfs2).astype(o_ref.dtype)


# -----------------------------------------------------------------------------
# Large-batch kernel: 2-phase grid (accumulate stats, then normalize).
# Grid = (phase, batch_tile); weights/params stay VMEM-resident across steps.
# -----------------------------------------------------------------------------
def _nlfi_tiled_kernel(x_ref, wc_ref, pp_ref, o_ref, stats_ref, ss_ref, *,
                       dout, inv_b):
    phase = pl.program_id(0)
    i = pl.program_id(1)

    x = x_ref[...]
    bc = pp_ref[0:1, :]
    y = jnp.dot(x, wc_ref[...], preferred_element_type=jnp.float32) + bc
    prod = y[:, 0 * dout:1 * dout] * y[:, 1 * dout:2 * dout]

    @pl.when(phase == 0)
    def _():
        @pl.when(i == 0)
        def _():
            stats_ref[...] = jnp.zeros_like(stats_ref)
        stats_ref[0:1, :] += jnp.sum(prod, axis=0, keepdims=True)
        stats_ref[1:2, :] += jnp.sum(prod * prod, axis=0, keepdims=True)

    @pl.when(phase == 1)
    def _():
        @pl.when(i == 0)
        def _():
            mean = stats_ref[0:1, :] * inv_b
            mean_sq = stats_ref[1:2, :] * inv_b
            var = jnp.maximum(mean_sq - mean * mean, 0.0)
            inv_std = jax.lax.rsqrt(var + EPS)
            scale = inv_std * pp_ref[1:2, 0:dout]
            shift = pp_ref[1:2, dout:2 * dout] - mean * scale
            ss_ref[0:1, :] = scale
            ss_ref[1:2, :] = shift
        nlfs2 = (jax.nn.sigmoid(y[:, 2 * dout:3 * dout]) *
                 jnp.tanh(y[:, 3 * dout:4 * dout]))
        o_ref[...] = (prod * ss_ref[0:1, :] + ss_ref[1:2, :] + nlfs2).astype(o_ref.dtype)


def _pick_tile_b(batch, cap=512):
    """Largest divisor of `batch` that is a multiple of 8 and <= cap."""
    best = None
    t = 8
    while t <= min(cap, batch):
        if batch % t == 0:
            best = t
        t += 8
    return best


# -----------------------------------------------------------------------------
# Wrapper: expects pre-fused parameters (wc, pp) from fuse_params().
# -----------------------------------------------------------------------------
def nonlinear_feature_interaction(x, wc, pp, *, single_tile_max=1024):
    B, Din = x.shape
    Dout = wc.shape[-1] // 4

    tile_b = _pick_tile_b(B)
    if B <= single_tile_max or tile_b is None:
        # Small batch: one invocation, everything fits in VMEM untiled.
        cost = pl.CostEstimate(
            flops=int(2 * B * Din * 4 * Dout + 12 * B * Dout),
            transcendentals=int(2 * B * Dout + Dout),      # sigmoid, tanh per elem; rsqrt per feature
            bytes_accessed=int((x.size + wc.size + pp.size + B * Dout) * 4),
        )
        return pl.pallas_call(
            _nlfi_single_kernel,
            out_shape=jax.ShapeDtypeStruct((B, Dout), jnp.float32),
            in_specs=[
                pl.BlockSpec(memory_space=pltpu.VMEM),      # x
                pl.BlockSpec(memory_space=pltpu.VMEM),      # fused weights (Din, 4*Dout)
                pl.BlockSpec(memory_space=pltpu.VMEM),      # packed bias/gamma/beta (8, 4*Dout)
            ],
            out_specs=pl.BlockSpec(memory_space=pltpu.VMEM),
            cost_estimate=cost,
        )(x, wc, pp)

    # Large batch: 2-phase grid, BN stats accumulated over the full batch.
    nb = B // tile_b
    kernel = functools.partial(_nlfi_tiled_kernel, dout=Dout, inv_b=1.0 / B)
    cost = pl.CostEstimate(
        flops=int(2 * (2 * B * Din * 4 * Dout) + 12 * B * Dout),   # matmul recomputed in phase 1
        transcendentals=int(2 * B * Dout + Dout),
        bytes_accessed=int((2 * x.size + wc.size + pp.size + B * Dout) * 4),
    )
    return pl.pallas_call(
        kernel,
        out_shape=jax.ShapeDtypeStruct((B, Dout), jnp.float32),
        grid_spec=pltpu.PrefetchScalarGridSpec(
            num_scalar_prefetch=0,
            grid=(2, nb),
            in_specs=[
                pl.BlockSpec((tile_b, Din), lambda p, i: (i, 0)),
                pl.BlockSpec((Din, 4 * Dout), lambda p, i: (0, 0)),   # resident weights
                pl.BlockSpec((8, 4 * Dout), lambda p, i: (0, 0)),     # resident packed params
            ],
            out_specs=pl.BlockSpec((tile_b, Dout), lambda p, i: (i, 0)),
            scratch_shapes=[
                pltpu.VMEM((2, Dout), jnp.float32),   # [sum; sumsq]
                pltpu.VMEM((2, Dout), jnp.float32),   # [scale; shift]
            ],
        ),
        compiler_params=pltpu.CompilerParams(
            dimension_semantics=("arbitrary", "arbitrary"),
        ),
        cost_estimate=cost,
    )(x, wc, pp)


# -----------------------------------------------------------------------------
# Pure-JAX reference (PyTorch training-mode BN semantics).
# -----------------------------------------------------------------------------
def _reference(x, w, b, gamma, beta):
    nls = [x @ w[i] + b[i] for i in range(4)]
    nlfs1 = nls[0] * nls[1]
    mean = jnp.mean(nlfs1, axis=0, keepdims=True)
    var = jnp.mean((nlfs1 - mean) ** 2, axis=0, keepdims=True)
    nlfs1 = (nlfs1 - mean) / jnp.sqrt(var + EPS) * gamma[None, :] + beta[None, :]
    nlfs2 = jax.nn.sigmoid(nls[2]) * jnp.tanh(nls[3])
    return nlfs1 + nlfs2


if __name__ == "__main__":
    # Small shapes consistent with the module: batch=8, input_shape=32, linear_out=32.
    B, Din, Dout = 8, 32, 32

    key = jax.random.PRNGKey(0)
    kx, kw, kb, kbeta, kx2 = jax.random.split(key, 5)

    x = jax.random.normal(kx, (B, Din), dtype=jnp.float32)
    bound = 1.0 / (Din ** 0.5)
    w = jax.random.uniform(kw, (4, Din, Dout), minval=-bound, maxval=bound,
                           dtype=jnp.float32)
    b = jax.random.uniform(kb, (4, Dout), minval=-bound, maxval=bound,
                           dtype=jnp.float32)
    gamma = jnp.ones((Dout,), dtype=jnp.float32)
    beta = 0.01 * jax.random.normal(kbeta, (Dout,), dtype=jnp.float32)

    # Init-time parameter fusion (runs once; not in the per-call hot path).
    wc, pp = fuse_params(w, b, gamma, beta)

    fwd = jax.jit(nonlinear_feature_interaction)

    # 1) Small-batch (single-tile) path.
    out = jax.block_until_ready(fwd(x, wc, pp))
    ref = _reference(x, w, b, gamma, beta)
    assert out.shape == (B, Dout)
    assert jnp.allclose(out, ref, atol=1e-4, rtol=1e-4), "small-batch mismatch"

    # 2) Batch-tiled grid path (accumulate-then-normalize BN over the full batch).
    B2 = 2048
    x2 = jax.random.normal(kx2, (B2, Din), dtype=jnp.float32)
    out2 = jax.block_until_ready(fwd(x2, wc, pp))
    ref2 = _reference(x2, w, b, gamma, beta)
    assert out2.shape == (B2, Dout)
    assert jnp.allclose(out2, ref2, atol=2e-3, rtol=2e-3), "tiled-batch mismatch"

    print("KERNEL_OK")
</pallas_src>

<mosaic_0001>
module attributes {stable_mosaic.version = 11 : i64} {
  func.func @_nlfi_single_kernel(%arg0: memref<8x32xf32, #tpu.memory_space<vmem>>, %arg1: memref<32x128xf32, #tpu.memory_space<vmem>>, %arg2: memref<8x128xf32, #tpu.memory_space<vmem>>, %arg3: memref<8x32xf32, #tpu.memory_space<vmem>>) attributes {dimension_semantics = [], scalar_prefetch = 0 : i64, scratch_operands = 0 : i64, tpu.core_type = #tpu.core_type<tc>} {
    %c0 = arith.constant 0 : index
    %c0_0 = arith.constant 0 : index
    %0 = vector.load %arg0[%c0, %c0_0] : memref<8x32xf32, #tpu.memory_space<vmem>>, vector<8x32xf32>
    %c0_1 = arith.constant 0 : index
    %c0_2 = arith.constant 0 : index
    %1 = vector.load %arg2[%c0_1, %c0_2] : memref<8x128xf32, #tpu.memory_space<vmem>>, vector<1x128xf32>
    %c0_3 = arith.constant 0 : index
    %c0_4 = arith.constant 0 : index
    %2 = vector.load %arg1[%c0_3, %c0_4] : memref<32x128xf32, #tpu.memory_space<vmem>>, vector<32x128xf32>
    %cst = arith.constant dense<0.000000e+00> : vector<8x128xf32>
    %3 = tpu.matmul %0, %2, %cst {dimension_numbers = #tpu.dot_dimension_numbers<[1], [0], [0], [1], [0, 0, 1, 1], [], []>} : vector<8x32xf32>, vector<32x128xf32>, vector<8x128xf32> -> vector<8x128xf32>
    %4 = vector.broadcast %1 : vector<1x128xf32> to vector<8x128xf32>
    %5 = arith.addf %3, %4 : vector<8x128xf32>
    %6 = vector.extract_strided_slice %5 {offsets = [0, 0], sizes = [8, 32], strides = [1, 1]} : vector<8x128xf32> to vector<8x32xf32>
    %7 = vector.extract_strided_slice %5 {offsets = [0, 32], sizes = [8, 32], strides = [1, 1]} : vector<8x128xf32> to vector<8x32xf32>
    %8 = vector.extract_strided_slice %5 {offsets = [0, 64], sizes = [8, 32], strides = [1, 1]} : vector<8x128xf32> to vector<8x32xf32>
    %9 = vector.extract_strided_slice %5 {offsets = [0, 96], sizes = [8, 32], strides = [1, 1]} : vector<8x128xf32> to vector<8x32xf32>
    %10 = arith.mulf %6, %7 : vector<8x32xf32>
    %cst_5 = arith.constant dense<0.000000e+00> : vector<32xf32>
    %11 = vector.multi_reduction <add>, %10, %cst_5 [0] : vector<8x32xf32> to vector<32xf32>
    %12 = vector.shape_cast %11 : vector<32xf32> to vector<1x32xf32>
    %cst_6 = arith.constant 1.250000e-01 : f32
    %13 = vector.broadcast %cst_6 : f32 to vector<1x32xf32>
    %14 = arith.mulf %12, %13 : vector<1x32xf32>
    %15 = arith.mulf %10, %10 : vector<8x32xf32>
    %cst_7 = arith.constant dense<0.000000e+00> : vector<32xf32>
    %16 = vector.multi_reduction <add>, %15, %cst_7 [0] : vector<8x32xf32> to vector<32xf32>
    %17 = vector.shape_cast %16 : vector<32xf32> to vector<1x32xf32>
    %cst_8 = arith.constant 1.250000e-01 : f32
    %18 = vector.broadcast %cst_8 : f32 to vector<1x32xf32>
    %19 = arith.mulf %17, %18 : vector<1x32xf32>
    %20 = arith.mulf %14, %14 : vector<1x32xf32>
    %21 = arith.subf %19, %20 : vector<1x32xf32>
    %cst_9 = arith.constant 0.000000e+00 : f32
    %22 = vector.broadcast %cst_9 : f32 to vector<1x32xf32>
    %23 = arith.maximumf %21, %22 : vector<1x32xf32>
    %cst_10 = arith.constant 9.99999974E-6 : f32
    %24 = vector.broadcast %cst_10 : f32 to vector<1x32xf32>
    %25 = arith.addf %23, %24 : vector<1x32xf32>
    %26 = math.rsqrt %25 : vector<1x32xf32>
    %c1 = arith.constant 1 : index
    %c0_11 = arith.constant 0 : index
    %27 = vector.load %arg2[%c1, %c0_11] : memref<8x128xf32, #tpu.memory_space<vmem>>, vector<1x32xf32>
    %c1_12 = arith.constant 1 : index
    %c32 = arith.constant 32 : index
    %28 = vector.load %arg2[%c1_12, %c32] : memref<8x128xf32, #tpu.memory_space<vmem>>, vector<1x32xf32>
    %29 = arith.mulf %26, %27 : vector<1x32xf32>
    %30 = arith.mulf %14, %29 : vector<1x32xf32>
    %31 = arith.subf %28, %30 : vector<1x32xf32>
    %32 = vector.broadcast %29 : vector<1x32xf32> to vector<8x32xf32>
    %33 = arith.mulf %10, %32 : vector<8x32xf32>
    %34 = vector.broadcast %31 : vector<1x32xf32> to vector<8x32xf32>
    %35 = arith.addf %33, %34 : vector<8x32xf32>
    %36 = arith.negf %8 : vector<8x32xf32>
    %37 = math.exp %36 : vector<8x32xf32>
    %cst_13 = arith.constant 1.000000e+00 : f32
    %38 = vector.broadcast %cst_13 : f32 to vector<8x32xf32>
    %39 = arith.addf %38, %37 : vector<8x32xf32>
    %40 = arith.divf %38, %39 : vector<8x32xf32>
    %41 = math.tanh %9 : vector<8x32xf32>
    %42 = arith.mulf %40, %41 : vector<8x32xf32>
    %43 = arith.addf %35, %42 : vector<8x32xf32>
    %c0_14 = arith.constant 0 : index
    %c0_15 = arith.constant 0 : index
    %44 = vector.load %arg3[%c0_14, %c0_15] : memref<8x32xf32, #tpu.memory_space<vmem>>, vector<8x32xf32>
    tpu.vector_store %arg3[%c0_14, %c0_15], %43 {strides = array<i32>} : memref<8x32xf32, #tpu.memory_space<vmem>>, vector<8x32xf32>,
    return
  }
}

</mosaic_0001>

<bundles_post_ra>
// kernel: nonlinear_feature_interaction.1
= control target key start
LH: loop header
LB: loop body
LE: loop exit
PB: predicated region body
PF: predicated region fallthrough
CT: control target
= control target key end

     0   :  { %8 = vsyncpa [#allocation3], 0  ;;  %s393_s0 = inlined_call_operand.hbm [shape: f32[8,32], index: 0, kind: input, shape index: {}]   ;;  %s394_s1 = inlined_call_operand.hbm [shape: f32[32,128], index: 1, kind: input, shape index: {}]   ;;  %s395_s2 = inlined_call_operand.hbm [shape: f32[8,128], index: 2, kind: input, shape index: {}]   ;;  %s396_s3 = inlined_call_operand.hbm [shape: f32[8,32], index: 3, kind: output, shape index: {}]  }
   0x1   :  { %9 = vsyncpa [#allocation6], 0 }
   0x2   :  { %10 = vsyncpa [#allocation4], 0  ;;  %s343_s12 = smov [#allocation5]  }
   0x3   :  { %s26_s13 = sshll.u32 %s343_s12, 4  ;;  %s27_s13 = int_to_ptr.vmem [resolvable:$true] %s26_s13 }
   0x4   :  { %s265_s14 = scalar_lea.vmem %s27_s13, 512  ;;  %p270_p1 = scmp.lt.s32.totalorder %s27_s13, %s27_s13 }
   0x5   :  { %p266_p0 = scmp.ne.s32.totalorder %s27_s13, %s265_s14  ;;  %p271_p2 = scmp.lt.s32.totalorder %s265_s14, %s265_s14 }
   0x7   :  { %p272_p3 = por %p271_p2, %p270_p1 }
   0x9   :  { %p273_p4 = pnand %p272_p3, %p266_p0 }
   0xb   :  { %276 = shalt.err (!%p273_p4)
}
   0xc   :  { %s344_s15 = smov 128   ;;  %s345_s16 = smov 8  }
   0xd   :  { %32 = dma.hbm_to_vmem [thread:$0]  %s394_s1, 512, %s27_s13, [#allocation6], %s344_s15, %s344_s15, %s345_s16  }
   0xe   :  { %s346_s19 = smov [#allocation2]   ;;  %s347_s21 = smov [#allocation7]  }
   0xf   :  { %s17_s20 = sshll.u32 %s346_s19, 4  ;;  %s39_s22 = sshll.u32 %s347_s21, 4  ;;  %s18_s20 = int_to_ptr.vmem [resolvable:$true] %s17_s20  ;;  %s40_s22 = int_to_ptr.vmem [resolvable:$true] %s39_s22 }
  0x10   :  { %s285_s23 = scalar_lea.vmem %s18_s20, 128  ;;  %p290_p6 = scmp.lt.s32.totalorder %s18_s20, %s18_s20 }
  0x11   :  { %p286_p5 = scmp.ne.s32.totalorder %s18_s20, %s285_s23  ;;  %p291_p7 = scmp.lt.s32.totalorder %s285_s23, %s285_s23 }
  0x13   :  { %p292_p8 = por %p291_p7, %p290_p6 }
  0x15   :  { %p293_p9 = pnand %p292_p8, %p286_p5 }
  0x17   :  { %296 = shalt.err (!%p293_p9)
}
  0x18   :  { %20 = dma.hbm_to_vmem [thread:$0]  %s393_s0, 128, %s18_s20, [#allocation3]  }
  0x19   :  { %s305_s26 = scalar_lea.vmem %s40_s22, 128  ;;  %p310_p11 = scmp.lt.s32.totalorder %s40_s22, %s40_s22 }
  0x1a   :  { %p306_p10 = scmp.ne.s32.totalorder %s40_s22, %s305_s26  ;;  %p311_p12 = scmp.lt.s32.totalorder %s305_s26, %s305_s26 }
  0x1c   :  { %p312_p13 = por %p311_p12, %p310_p11 }
  0x1e   :  { %p313_p0 = pnand %p312_p13, %p306_p10 }
  0x20   :  { %316 = shalt.err (!%p313_p0)
}
  0x21   :  { %42 = dma.hbm_to_vmem [thread:$0]  %s395_s2, 128, %s40_s22, [#allocation6]  }
  0x22   :  { %337 = dma.done.wait [#allocation3], 128  }
  0x23   :  { %338 = vsyncadd [#allocation3], 4294967168 }
  0x24   :  { %339 = dma.done.wait [#allocation6], 640  }
  0x25   :  { %340 = vsyncadd [#allocation6], 4294966656  ;;  %v348_v0 = vmov 0.0   ;;  %vm349_vm0 = vmmov 0   ;;  %v57_v1 = vld [vmem:[#allocation5 + $0x18] sm:$0xff]  ;;  %v56_v2 = vld [vmem:[#allocation5 + $0x10] sm:$0xff]  ;;  %v171_v37 = vlaneseq }
  0x26   :  { %227 = vmatprep.subr.mxu0 %v348_v0  ;;  %235 = vmatprep.mubr.msk.f32.mxu0 %vm349_vm0, %v348_v0  ;;  %v55_v3 = vld [vmem:[#allocation5 + $0x8] sm:$0xff]  ;;  %v54_v4 = vld [vmem:[#allocation5] sm:$0xff]  ;;  %v52_v5 = vld [vmem:[#allocation2] sm:$0xff]  ;;  %vm62_vm1 = vcmask 261120   ;;  %s350_s0 = smov 96   ;;  %s351_s2 = smov 32  }
  0x27   :  { %228 = vmatpush3.msra.mxu0 %v57_v1  ;;  %v219_v6 = vld [vmem:[#allocation7] ss:$0 sm:$0xff]  ;;  %v172_v38 = vshrl.u32 %v171_v37, 7  ;;  %v163_v39 = vld [vmem:[#allocation7 + $0x1] sm:$0x1]  ;;  %s352_s28 = smov 64  }
  0x28   :  { %229 = vmatprep.subr.mxu0 %v348_v0  ;;  %s353_s29 = smov [#allocation8]  }
  0x29   :  { %230 = vmatpush3.msra.mxu0 %v56_v2  ;;  %v173_v40 = vsub.s32 0, %v172_v38  ;;  %s209_s30 = sshll.u32 %s353_s29, 4  ;;  %s210_s30 = int_to_ptr.vmem [resolvable:$true] %s209_s30 }
  0x2a   :  { %231 = vmatprep.subr.mxu0 %v348_v0  ;;  %s317_s4 = scalar_lea.vmem %s210_s30, 128  ;;  %p322_p2 = scmp.lt.s32.totalorder %s210_s30, %s210_s30 }
  0x2b   :  { %232 = vmatpush3.msra.mxu0 %v55_v3  ;;  %p318_p1 = scmp.ne.s32.totalorder %s210_s30, %s317_s4  ;;  %p323_p3 = scmp.lt.s32.totalorder %s317_s4, %s317_s4 }
  0x2c   :  { %233 = vmatprep.subr.mxu0 %v348_v0 }
  0x2d   :  { %234 = vmatpush3.msra.mxu0 %v54_v4  ;;  %p324_p4 = por %p323_p3, %p322_p2 }
  0x2e   :  { %236 = vmatmul.mubr.msk.f32.vlgmr.msra.gmra.mxu0 %vm62_vm1, %v52_v5 }
  0x2f   :  { %p325_p5 = pnand %p324_p4, %p318_p1 }
  0xee   :  { %v132_v7 = vpop.f32.mrf.mxu0 }
  0xef   :  { %v133_v8 = vadd.f32 %v219_v6, %v132_v7 }
  0xf0   :  { %v237_v9 = vpop.f32.mrf.mxu0 }
  0xf1   :  { %249 = vtanh.f32 %v133_v8  ;;  %137 = vrot.lane.b32.xlu0 %v133_v8, %s350_s0  ;;  %v221_v19 = vmul.f32 -1.442695, %v133_v8 }
  0xf3   :  { %251 = vpow2.f32 %v221_v19 }
  0xfe   :  { %v250_v10 = vpop.eup %249 }
  0xff   :  { %193 = vrot.lane.b32.xlu1 %v250_v10, %s350_s0 }
 0x100   :  { %v252_v35 = vpop.eup %251 }
 0x101   :  { %v188_v36 = vadd.f32 1.0, %v252_v35 }
 0x163   :  { %v138_v11 = vpop.permute.xlu0 %137 }
 0x164   :  { %v140_v12 = vmul.f32 %v138_v11, %v133_v8 }
 0x166   :  { %v141_v13 = vsel %vm62_vm1, %v140_v12, 0.0  ;;  %v149_v14 = vmul.f32 %v140_v12, %v140_v12 }
 0x167   :  { %v142_v15 = vrot.slane %v141_v13, 4 }
 0x168   :  { %v150_v16 = vsel %vm62_vm1, %v149_v14, 0.0 }
 0x169   :  { %v143_v17 = vadd.f32 %v142_v15, %v141_v13  ;;  %v151_v18 = vrot.slane %v150_v16, 4 }
 0x16b   :  { %v144_v20 = vrot.slane %v143_v17, 2  ;;  %v152_v21 = vadd.f32 %v151_v18, %v150_v16 }
 0x16d   :  { %v145_v22 = vadd.f32 %v144_v20, %v143_v17  ;;  %v153_v23 = vrot.slane %v152_v21, 2 }
 0x16f   :  { %v154_v24 = vadd.f32 %v153_v23, %v152_v21  ;;  %v146_v25 = vrot.slane %v145_v22, 1 }
 0x171   :  { %v155_v26 = vrot.slane %v154_v24, 1  ;;  %v147_v27 = vadd.f32 %v146_v25, %v145_v22  ;;  %v194_v45 = vpop.permute.xlu1 %193 }
 0x173   :  { %v156_v28 = vadd.f32 %v155_v26, %v154_v24  ;;  %v148_v29 = vmul.f32 0.125, %v147_v27 }
 0x175   :  { %v157_v30 = vmul.f32 0.125, %v156_v28  ;;  %v158_v31 = vmul.f32 %v148_v29, %v148_v29 }
 0x177   :  { %v159_v32 = vsub.f32 %v157_v30, %v158_v31 }
 0x179   :  { %v160_v33 = vmax.f32 %v159_v32, 0.0 }
 0x17b   :  { %v161_v34 = vadd.f32 1e-05, %v160_v33 }
 0x17d   :  { %253 = vrsqrt.f32 %v161_v34 }
 0x17e   :  { %255 = vrcp.f32 %v188_v36 }
 0x18a   :  { %v254_v41 = vpop.eup %253 }
 0x18b   :  { %v164_v42 = vmul.f32 %v254_v41, %v163_v39  ;;  %v256_v47 = vpop.eup %255 }
 0x18c   :  { %v196_v48 = vmul.f32 %v256_v47, %v194_v45 }
 0x18d   :  { %v165_v43 = vmul.f32 %v164_v42, %v148_v29  ;;  %v174_v44 = vrot.slane %v164_v42, %v173_v40 }
 0x18f   :  { %167 = vrot.lane.b32.xlu0 %v165_v43, %s351_s2  ;;  %v175_v46 = vmul.f32 %v174_v44, %v140_v12 }
 0x193   :  { %198 = vrot.lane.b32.xlu0 %v196_v48, %s352_s28 }
 0x201   :  { %v168_v49 = vpop.permute.xlu0 %167 }
 0x202   :  { %v170_v50 = vsub.f32 %v163_v39, %v168_v49 }
 0x204   :  { %v179_v51 = vrot.slane %v170_v50, %v173_v40 }
 0x205   :  { %v199_v54 = vpop.permute.xlu0 %198 }
 0x206   :  { %181 = vrot.lane.b32.xlu1 %v179_v51, %s350_s0 }
 0x278   :  { %v182_v52 = vpop.permute.xlu1 %181 }
 0x279   :  { %v184_v53 = vadd.f32 %v182_v52, %v175_v46 }
 0x27b   :  { %v201_v55 = vadd.f32 %v199_v54, %v184_v53 }
 0x27d   :  { %202 = vst.msk [vmem:[#allocation8] sm:$0xff] %vm62_vm1, %v201_v55 }
 0x27e   :  { %328 = shalt.err (!%p325_p5)
}
 0x27f   :  { %212 = dma.vmem_to_hbm [thread:$0]  %s210_s30, 128, %s396_s3, [#allocation4]  }
 0x280   :  { %341 = dma.done.wait [#allocation4], 128  }
 0x281   :  { %342 = vsyncadd [#allocation4], 4294967168 }
 0x282   :  { %216 = vsyncpa [#allocation3], 1 }
 0x283   :  { %217 = vsyncpa [#allocation6], 1 }
 0x284   :  { %218 = vsyncpa [#allocation4], 1 }

</bundles_post_ra>
